<compile_context>
chip_gen: v7x
topology: tpu7x:2x2x1
jax: 0.10.0
libtpu: 0.0.40
codegen_flags: <defaults>
</compile_context>

<pallas_src>
import jax
import jax.numpy as jnp
from jax.experimental import pallas as pl
from jax.experimental.pallas import tpu as pltpu

_EPS = 1e-5


def _layernorm_nchw_kernel(x_ref, gamma_ref, beta_ref, o_ref):
    # x_ref / o_ref: (TB, C, THW)   gamma_ref / beta_ref: (1, C, 1) float32
    x = x_ref[...].astype(jnp.float32)                       # (TB, C, THW)
    inv_c = 1.0 / x.shape[1]
    # One-pass moments over the channel (sublane) axis.
    s = jnp.sum(x, axis=1, keepdims=True)                    # (TB, 1, THW)
    ss = jnp.sum(x * x, axis=1, keepdims=True)               # (TB, 1, THW)
    mean = s * inv_c
    var = jnp.maximum(ss * inv_c - mean * mean, 0.0)         # biased var, clamped
    inv = jax.lax.rsqrt(var + _EPS)
    y = (x - mean) * inv * gamma_ref[...] + beta_ref[...]
    o_ref[...] = y.astype(o_ref.dtype)


def _pick_tile(B, C, HW, itemsize, target_bytes=2 << 20):
    """Choose (TB, THW): batch-folded, lane-dense, exact-tiling blocks."""
    item_bytes = max(1, C * HW * itemsize)
    if item_bytes <= target_bytes:
        # Whole spatial extent per block (no ragged H*W tail); fold batch
        # items until ~target_bytes so DMAs reach HBM roofline and the
        # ~0.35 us per-grid-step overhead is amortized.
        thw = HW
        tb = max(1, min(B, target_bytes // item_bytes))
        while B % tb:                 # exact batch tiling: no masked blocks
            tb -= 1
    else:
        # A single batch item already exceeds the budget: split H*W into
        # equal pieces that divide it exactly (exactness preferred over
        # strict multiple-of-128 rounding, so there is never a tiny tail).
        tb = 1
        target_lanes = max(128, target_bytes // (C * itemsize))
        thw = 0
        for n in range(1, 4097):
            if HW % n == 0 and HW // n <= target_lanes:
                thw = HW // n
                break
        if thw < 128:
            # Pathological (near-prime) H*W: lane-dense tile + masked tail;
            # the math is column-independent so padded lanes are harmless.
            thw = min(HW, (target_lanes // 128) * 128)

    # v7x has two TensorCores sharing HBM: guarantee >=2 parallel grid steps
    # when the batch allows it (harmless extra step on single-TC v5e/v6e).
    if B > 1 and (B // tb) * pl.cdiv(HW, thw) < 2:
        tb = max(1, B // 2)
        while B % tb:
            tb -= 1
    return tb, thw


@jax.jit
def layernorm2d(x, gamma, beta):
    """Forward of LayerNorm2d. x: (B, C, H, W) NCHW; gamma/beta: (C,)."""
    B, C, H, W = x.shape
    HW = H * W
    x3 = x.reshape(B, C, HW)          # free reshape; stays in native NCHW layout

    tb, thw = _pick_tile(B, C, HW, jnp.dtype(x.dtype).itemsize)
    n_b = pl.cdiv(B, tb)
    n_hw = pl.cdiv(HW, thw)

    gamma3d = gamma.reshape(1, C, 1).astype(jnp.float32)
    beta3d = beta.reshape(1, C, 1).astype(jnp.float32)

    out3 = pl.pallas_call(
        _layernorm_nchw_kernel,
        out_shape=jax.ShapeDtypeStruct((B, C, HW), x.dtype),
        grid_spec=pltpu.PrefetchScalarGridSpec(
            num_scalar_prefetch=0,
            grid=(n_b, n_hw),
            in_specs=[
                pl.BlockSpec((tb, C, thw), lambda b, j: (b, 0, j)),
                pl.BlockSpec((1, C, 1), lambda b, j: (0, 0, 0)),
                pl.BlockSpec((1, C, 1), lambda b, j: (0, 0, 0)),
            ],
            out_specs=pl.BlockSpec((tb, C, thw), lambda b, j: (b, 0, j)),
        ),
        compiler_params=pltpu.CompilerParams(
            dimension_semantics=("parallel", "parallel"),
            vmem_limit_bytes=32 * 1024 * 1024,
        ),
    )(x3, gamma3d, beta3d)

    return out3.reshape(B, C, H, W)


def _reference(x, gamma, beta):
    # Pure-JAX reference of the PyTorch module (permute -> LayerNorm(C) -> permute).
    x_nhwc = jnp.transpose(x, (0, 2, 3, 1)).astype(jnp.float32)
    mean = jnp.mean(x_nhwc, axis=-1, keepdims=True)
    var = jnp.mean((x_nhwc - mean) ** 2, axis=-1, keepdims=True)
    y = (x_nhwc - mean) / jnp.sqrt(var + _EPS)
    y = y * gamma + beta
    return jnp.transpose(y, (0, 3, 1, 2)).astype(x.dtype)


if __name__ == "__main__":
    key = jax.random.PRNGKey(0)
    kx, kg, kb = jax.random.split(key, 3)
    B, C, H, W = 2, 4, 16, 16
    x = jax.random.normal(kx, (B, C, H, W), dtype=jnp.float32)

    # nn.LayerNorm(C) affine params (default init is ones/zeros; use random
    # values here so the affine path is actually exercised).
    gamma = 1.0 + 0.1 * jax.random.normal(kg, (C,), dtype=jnp.float32)
    beta = 0.1 * jax.random.normal(kb, (C,), dtype=jnp.float32)

    out = layernorm2d(x, gamma, beta)
    out = jax.block_until_ready(out)

    ref = _reference(x, gamma, beta)
    assert out.shape == (B, C, H, W)
    assert jnp.allclose(out, ref, atol=1e-5, rtol=1e-5)

    print("KERNEL_OK")
</pallas_src>

<mosaic_0001>
module attributes {stable_mosaic.version = 11 : i64} {
  func.func @_layernorm_nchw_kernel(%arg0: i32, %arg1: i32, %arg2: memref<1x4x256xf32, #tpu.memory_space<vmem>>, %arg3: memref<1x4x1xf32, #tpu.memory_space<vmem>>, %arg4: memref<1x4x1xf32, #tpu.memory_space<vmem>>, %arg5: memref<1x4x256xf32, #tpu.memory_space<vmem>>) attributes {dimension_semantics = [#tpu.dimension_semantics<parallel>, #tpu.dimension_semantics<parallel>], iteration_bounds = array<i64: 2, 1>, scalar_prefetch = 0 : i64, scratch_operands = 0 : i64, tpu.core_type = #tpu.core_type<tc>, window_params = [{transform_indices = @transform_0, window_bounds = array<i64: 1, 4, 256>}, {pipeline_mode = #tpu.pipeline_mode<synchronous>, transform_indices = @transform_1, window_bounds = array<i64: 1, 4, 1>}, {pipeline_mode = #tpu.pipeline_mode<synchronous>, transform_indices = @transform_2, window_bounds = array<i64: 1, 4, 1>}, {transform_indices = @transform_3, window_bounds = array<i64: 1, 4, 256>}]} {
    %c0 = arith.constant 0 : index
    %c0_0 = arith.constant 0 : index
    %c0_1 = arith.constant 0 : index
    %0 = vector.load %arg2[%c0, %c0_0, %c0_1] : memref<1x4x256xf32, #tpu.memory_space<vmem>>, vector<1x4x256xf32>
    %cst = arith.constant dense<0.000000e+00> : vector<1x256xf32>
    %1 = vector.multi_reduction <add>, %0, %cst [1] : vector<1x4x256xf32> to vector<1x256xf32>
    %2 = vector.shape_cast %1 : vector<1x256xf32> to vector<1x1x256xf32>
    %3 = arith.mulf %0, %0 : vector<1x4x256xf32>
    %cst_2 = arith.constant dense<0.000000e+00> : vector<1x256xf32>
    %4 = vector.multi_reduction <add>, %3, %cst_2 [1] : vector<1x4x256xf32> to vector<1x256xf32>
    %5 = vector.shape_cast %4 : vector<1x256xf32> to vector<1x1x256xf32>
    %cst_3 = arith.constant 2.500000e-01 : f32
    %6 = vector.broadcast %cst_3 : f32 to vector<1x1x256xf32>
    %7 = arith.mulf %2, %6 : vector<1x1x256xf32>
    %cst_4 = arith.constant 2.500000e-01 : f32
    %8 = vector.broadcast %cst_4 : f32 to vector<1x1x256xf32>
    %9 = arith.mulf %5, %8 : vector<1x1x256xf32>
    %10 = arith.mulf %7, %7 : vector<1x1x256xf32>
    %11 = arith.subf %9, %10 : vector<1x1x256xf32>
    %cst_5 = arith.constant 0.000000e+00 : f32
    %12 = vector.broadcast %cst_5 : f32 to vector<1x1x256xf32>
    %13 = arith.maximumf %11, %12 : vector<1x1x256xf32>
    %cst_6 = arith.constant 9.99999974E-6 : f32
    %14 = vector.broadcast %cst_6 : f32 to vector<1x1x256xf32>
    %15 = arith.addf %13, %14 : vector<1x1x256xf32>
    %16 = math.rsqrt %15 : vector<1x1x256xf32>
    %17 = vector.broadcast %7 : vector<1x1x256xf32> to vector<1x4x256xf32>
    %18 = arith.subf %0, %17 : vector<1x4x256xf32>
    %19 = vector.broadcast %16 : vector<1x1x256xf32> to vector<1x4x256xf32>
    %20 = arith.mulf %18, %19 : vector<1x4x256xf32>
    %c0_7 = arith.constant 0 : index
    %c0_8 = arith.constant 0 : index
    %c0_9 = arith.constant 0 : index
    %21 = vector.load %arg3[%c0_7, %c0_8, %c0_9] : memref<1x4x1xf32, #tpu.memory_space<vmem>>, vector<1x4x1xf32>
    %22 = vector.broadcast %21 : vector<1x4x1xf32> to vector<1x4x256xf32>
    %23 = arith.mulf %20, %22 : vector<1x4x256xf32>
    %c0_10 = arith.constant 0 : index
    %c0_11 = arith.constant 0 : index
    %c0_12 = arith.constant 0 : index
    %24 = vector.load %arg4[%c0_10, %c0_11, %c0_12] : memref<1x4x1xf32, #tpu.memory_space<vmem>>, vector<1x4x1xf32>
    %25 = vector.broadcast %24 : vector<1x4x1xf32> to vector<1x4x256xf32>
    %26 = arith.addf %23, %25 : vector<1x4x256xf32>
    %c0_13 = arith.constant 0 : index
    %c0_14 = arith.constant 0 : index
    %c0_15 = arith.constant 0 : index
    %27 = vector.load %arg5[%c0_13, %c0_14, %c0_15] : memref<1x4x256xf32, #tpu.memory_space<vmem>>, vector<1x4x256xf32>
    tpu.vector_store %arg5[%c0_13, %c0_14, %c0_15], %26 {strides = array<i32>} : memref<1x4x256xf32, #tpu.memory_space<vmem>>, vector<1x4x256xf32>,
    return
  }
  func.func @transform_0(%arg0: i32, %arg1: i32) -> (i32, i32, i32) {
    %c0_i32 = arith.constant 0 : i32
    %c0_i32_0 = arith.constant 0 : i32
    return %arg0, %c0_i32, %arg1 : i32, i32, i32
  }
  func.func @transform_1(%arg0: i32, %arg1: i32) -> (i32, i32, i32) {
    %c0_i32 = arith.constant 0 : i32
    %c0_i32_0 = arith.constant 0 : i32
    %c0_i32_1 = arith.constant 0 : i32
    %c0_i32_2 = arith.constant 0 : i32
    return %c0_i32, %c0_i32_0, %c0_i32_1 : i32, i32, i32
  }
  func.func @transform_2(%arg0: i32, %arg1: i32) -> (i32, i32, i32) {
    %c0_i32 = arith.constant 0 : i32
    %c0_i32_0 = arith.constant 0 : i32
    %c0_i32_1 = arith.constant 0 : i32
    %c0_i32_2 = arith.constant 0 : i32
    return %c0_i32, %c0_i32_0, %c0_i32_1 : i32, i32, i32
  }
  func.func @transform_3(%arg0: i32, %arg1: i32) -> (i32, i32, i32) {
    %c0_i32 = arith.constant 0 : i32
    %c0_i32_0 = arith.constant 0 : i32
    return %arg0, %c0_i32, %arg1 : i32, i32, i32
  }
}

</mosaic_0001>

<bundles_post_ra>
// kernel: layernorm2d.1
= control target key start
LH: loop header
LB: loop body
LE: loop exit
PB: predicated region body
PF: predicated region fallthrough
CT: control target
= control target key end

     0   :  { %s478_s12 = smov 0   ;;  %s480_s13 = smov 0   ;;  %s524_s0 = inlined_call_operand.vmem [shape: f32[2,4,256], index: 0, kind: input, shape index: {}]   ;;  %s525_s1 = inlined_call_operand.vmem [shape: f32[1,4,1], index: 1, kind: input, shape index: {}]   ;;  %s526_s2 = inlined_call_operand.vmem [shape: f32[1,4,1], index: 2, kind: input, shape index: {}]   ;;  %s527_s3 = inlined_call_operand.vmem [shape: f32[2,4,256], index: 3, kind: output, shape index: {}]  }
   0x1   :  { %s482_s14 = smov 0  }
   0x2 LB: > { %s25_s15 = sadd.s32 1, %s450_s13  ;;  %p391_p0 = scmp.ge.s32.totalorder %s454_s14, 1  ;;  %s454_s14 = sphi %s482_s14, %s13_s14   ;;  %s450_s13 = sphi %s480_s13, %s529_s13   ;;  %s446_s12 = sphi %s478_s12, %s528_s12  }
   0x3   : > { %p27_p1 = scmp.ge.s32.totalorder %s25_s15, 2  ;;  %p158_p2 = scmp.lt.s32.totalorder %s454_s14, 3 }
   0x5   : > { %s531_s15 = smov (%p27_p1, %s25_s15), 0  ;;  %p159_p3 = pnand %p391_p0, %p158_p2 }
   0x6   : > { %v271_v0 = vld [vmem:[%s525_s1] sm:$0xf] (!%p159_p3)  ;;  %v456_v1 = vmov (!%p159_p3), 0   ;;  %p191_p4 = scmp.lt.s32.totalorder (!%p159_p3), %s446_s12, 1  ;;  %vm214_vm0 = vcmask (!%p159_p3), 1043456   ;;  %v279_v49 = vlaneseq (!%p159_p3) }
   0x7   : > { %162 = sbr.rel (%p159_p3) target bundleno = 145 (0x91), region = 32  ;;  %426 = vset.pattern.permute.xlu0 (!%p159_p3), %v456_v1  ;;  %v285_v2 = vld [vmem:[%s526_s2] sm:$0xf] (!%p159_p3)  ;;  %v457_v47 = vmov (!%p159_p3), 839922192  }
   0x8   : > { %274 = vperm.xlu0 (!%p159_p3), %426, %v271_v0   ;;  %v277_v48 = vunpack.c.l.s4 (!%p159_p3), %v457_v47  ;;  %v280_v52 = vshrl.u32 (!%p159_p3), %v279_v49, 7 }
   0xa   : > { %v278_v51 = vunpack.c.0.s8 (!%p159_p3), %v277_v48 }
   0xc   : > { %288 = vperm.xlu0 (!%p159_p3), %426, %v285_v2   ;;  %v281_v55 = vsub.s32 (!%p159_p3), %v278_v51, %v280_v52 }
   0xe   : > { %s533_s12 = smov (!%p191_p4, %s446_s12), 1 }
   0xf   : > { %s398_s20 = sshll.u32 %s533_s12, 3 }
  0x10   : > { %s198_s23 = scalar_lea.vmem %s524_s0, %s398_s20  ;;  %s208_s26 = scalar_lea.vmem %s527_s3, %s398_s20 }
  0x11   : > { %v210_v3 = vld [vmem:[%s198_s23] sm:$0xff] }
  0x12   : > { %v212_v4 = vcombine.high %v210_v3, %v210_v3  ;;  %v229_v5 = vmul.f32 %v210_v3, %v210_v3  ;;  %v215_v6 = vsel %vm214_vm0, %v210_v3, 0.0 }
  0x13   : > { %v216_v9 = vrot.slane %v215_v6, 4 }
  0x14   : > { %v222_v7 = vsel %vm214_vm0, %v212_v4, 0.0  ;;  %v231_v8 = vcombine.high %v229_v5, %v229_v5  ;;  %v233_v11 = vsel %vm214_vm0, %v229_v5, 0.0 }
  0x15   : > { %v223_v10 = vrot.slane %v222_v7, 4  ;;  %v217_v13 = vadd.f32 %v216_v9, %v215_v6  ;;  %v234_v14 = vrot.slane %v233_v11, 4 }
  0x16   : > { %v240_v12 = vsel %vm214_vm0, %v231_v8, 0.0 }
  0x17   : > { %v224_v15 = vadd.f32 %v223_v10, %v222_v7  ;;  %v241_v16 = vrot.slane %v240_v12, 4  ;;  %v218_v17 = vrot.slane %v217_v13, 2  ;;  %v235_v18 = vadd.f32 %v234_v14, %v233_v11 }
  0x19   : > { %v225_v19 = vrot.slane %v224_v15, 2  ;;  %v242_v20 = vadd.f32 %v241_v16, %v240_v12  ;;  %v219_v21 = vadd.f32 %v218_v17, %v217_v13  ;;  %v236_v22 = vrot.slane %v235_v18, 2 }
  0x1b   : > { %v226_v23 = vadd.f32 %v225_v19, %v224_v15  ;;  %v243_v24 = vrot.slane %v242_v20, 2  ;;  %v220_v25 = vrot.slane %v219_v21, 1  ;;  %v237_v26 = vadd.f32 %v236_v22, %v235_v18 }
  0x1d   : > { %v227_v27 = vrot.slane %v226_v23, 1  ;;  %v244_v28 = vadd.f32 %v243_v24, %v242_v20  ;;  %v221_v29 = vadd.f32 %v220_v25, %v219_v21  ;;  %v238_v30 = vrot.slane %v237_v26, 1 }
  0x1f   : > { %v228_v31 = vadd.f32 %v227_v27, %v226_v23  ;;  %v245_v32 = vrot.slane %v244_v28, 1  ;;  %v239_v33 = vadd.f32 %v238_v30, %v237_v26  ;;  %v247_v34 = vmul.f32 0.25, %v221_v29 }
  0x21   : > { %v246_v35 = vadd.f32 %v245_v32, %v244_v28  ;;  %v248_v36 = vmul.f32 0.25, %v228_v31  ;;  %v249_v37 = vmul.f32 0.25, %v239_v33  ;;  %v251_v38 = vmul.f32 %v247_v34, %v247_v34 }
  0x23   : > { %v250_v39 = vmul.f32 0.25, %v246_v35  ;;  %v252_v40 = vmul.f32 %v248_v36, %v248_v36  ;;  %v253_v41 = vsub.f32 %v249_v37, %v251_v38  ;;  %v263_v53 = vcombine.low %v247_v34, %v248_v36 }
  0x25   : > { %v254_v42 = vsub.f32 %v250_v39, %v252_v40  ;;  %v255_v43 = vmax.f32 %v253_v41, 0.0  ;;  %v265_v56 = vsub.f32 %v210_v3, %v263_v53 }
  0x27   : > { %v256_v44 = vmax.f32 %v254_v42, 0.0  ;;  %v257_v45 = vadd.f32 1e-05, %v255_v43 }
  0x29   : > { %v258_v46 = vadd.f32 1e-05, %v256_v44  ;;  %428 = vrsqrt.f32 %v257_v45 }
  0x2b   : > { %430 = vrsqrt.f32 %v258_v46 }
  0x33   : > { %v429_v50 = vpop.eup %428 }
  0x35   : > { %v431_v54 = vpop.eup %430 }
  0x36   : > { %v268_v57 = vcombine.low %v429_v50, %v431_v54 }
  0x38   : > { %v270_v59 = vmul.f32 %v268_v57, %v265_v56 }
  0x87   : > { %v275_v58 = vpop.permute.xlu0 %274 }
  0x88   : > { %v282_v60 = vrot.slane %v275_v58, %v281_v55 }
  0x8a   : > { %v284_v62 = vmul.f32 %v282_v60, %v270_v59 }
  0x8b   : > { %v289_v61 = vpop.permute.xlu0 %288 }
  0x8c   : > { %v296_v63 = vrot.slane %v289_v61, %v281_v55 }
  0x8e   : > { %v298_v0 = vadd.f32 %v296_v63, %v284_v62 }
  0x90   : > { %299 = vst [vmem:[%s208_s26] sm:$0xff] %v298_v0 }
  0x91 PF: > { %s13_s14 = sadd.s32 1, %s454_s14   ;;  %s528_s12 = smov %s450_s13 }
  0x92   : > { %p10_p5 = scmp.ge.s32.totalorder %s13_s14, 4   ;;  %s529_s13 = smov %s531_s15 }
  0x94   :  { %12 = sbr.rel (!%p10_p5) target bundleno = 2 (0x2), region = 62 }

</bundles_post_ra>
